<compile_context>
chip_gen: v7x
topology: tpu7x:2x2x1
jax: 0.10.0
libtpu: 0.0.40
codegen_flags: <defaults>
</compile_context>

<pallas_src>
import functools

import numpy as np
import jax
import jax.numpy as jnp
from jax import lax
from jax.experimental import pallas as pl
from jax.experimental.pallas import tpu as pltpu

# CDMSL hyper-parameters (torch __init__ defaults)
THRESH = 0.001
SCALE_POS = 2.0
SCALE_NEG = 50.0


def _round_up(x, m):
    return (x + m - 1) // m * m


def _tiles(n_points):
    """Returns (Np, TX, TY): padded point count and x/y distance-tile sizes."""
    if n_points <= 512:
        return n_points, n_points, n_points          # single tile, no padding
    t = 256                                          # (256, 256) f32 tile = 16 vregs/value
    return _round_up(n_points, t), t, t


def _vmem_limit_bytes(batch, n_pad, n_y, tx, ty):
    lane = lambda v: _round_up(v, 128)
    sub = lambda v: _round_up(v, 8)
    planes4 = 3 * batch * sub(n_y) * lane(ty) * 4    # y rows (points on lanes)
    planes_t = 3 * sub(n_pad) * lane(batch) * 4      # x cols (points on sublanes)
    out_blk = sub(2) * lane(batch) * 4
    yx = sub(n_y) * lane(ty) * 4
    temps = 10 * sub(tx) * lane(ty) * 4 + (2 << 20)  # distance-tile temporaries + slack
    est = 2 * (planes4 + planes_t) + 2 * out_blk + yx + temps
    try:  # generation-aware cap (v5e/v6e: 128 MiB physical, v7x: 64 MiB per core)
        info = pltpu.get_tpu_info()
        phys = getattr(info, "vmem_capacity_bytes", None) or (64 << 20)
    except Exception:
        phys = 64 << 20
    cap = int(phys * 0.85)
    return int(min(max(est, 32 << 20), max(cap, 32 << 20)))


# --------------------------------------------------------------------------------
# Kernel: grid step g computes the strict-upper-triangle parts of rows g and
# B-1-g of the pairwise chamfer matrix (balanced triangular work per step).
# x points (cloud i) live on sublanes, y points (cloud j) on lanes, so both
# min-reductions are dense and the output rows are lane-dense.
# --------------------------------------------------------------------------------
def _chamfer_rows_kernel(planes_ref, planesT_ref, out_ref, yx_ref, *,
                         n_real, n_pad, batch, tx, ty):
    g = pl.program_id(0)
    n_x = n_pad // tx
    n_y = n_pad // ty
    padded = n_pad != n_real
    inv_n = jnp.float32(1.0 / n_real)
    lane_b = lax.broadcasted_iota(jnp.int32, (1, batch), 1)       # cloud index on lanes

    if padded:
        pt_idx = (lax.broadcasted_iota(jnp.int32, (n_y, ty), 0) * ty
                  + lax.broadcasted_iota(jnp.int32, (n_y, ty), 1))
        yx_valid = pt_idx < n_real                                # mask for padded y pts

    def x_col(i, coord, xs):
        # (tx, 1) sublane column of coordinate `coord` of cloud i, taken from the
        # sublane-dense resident copy via a lane one-hot select + lane-sum
        # (no transpose, no dynamic lane offsets).
        blk = planesT_ref[coord, pl.ds(xs, tx), :]                # (tx, B)
        return jnp.sum(jnp.where(lane_b == i, blk, 0.0), axis=1, keepdims=True)

    def y_row(j, coord, c):
        # (1, ty) lane row of coordinate `coord` of cloud j, y-chunk c.
        v = planes_ref[coord, pl.ds(j, 1), pl.ds(c, 1), :]        # (1, 1, ty)
        return v.reshape(1, ty)

    def chamfer_pair(i, j):
        # running min over x for every y point of cloud j (lane-dense scratch)
        yx_ref[...] = jnp.full((n_y, ty), jnp.inf, jnp.float32)

        def body_x(xi, acc_xy):
            xs = xi * tx
            if tx % 8 == 0:
                xs = pl.multiple_of(xs, tx)
            x0 = x_col(i, 0, xs)
            x1 = x_col(i, 1, xs)
            x2 = x_col(i, 2, xs)
            if padded:
                sub_valid = (lax.broadcasted_iota(jnp.int32, (tx, 1), 0) + xs) < n_real

            def body_y(c, mins):
                y0 = y_row(j, 0, c)
                y1 = y_row(j, 1, c)
                y2 = y_row(j, 2, c)
                d0 = x0 - y0
                d1 = x1 - y1
                d2 = x2 - y2
                d = d0 * d0 + d1 * d1 + d2 * d2                   # (tx, ty) on the VPU
                if padded:
                    lane_valid = (lax.broadcasted_iota(jnp.int32, (1, ty), 1)
                                  + c * ty) < n_real
                    d = jnp.where(sub_valid & lane_valid, d, jnp.inf)
                mins = jnp.minimum(mins, jnp.min(d, axis=1, keepdims=True))   # per x
                cur = yx_ref[pl.ds(c, 1), :]
                yx_ref[pl.ds(c, 1), :] = jnp.minimum(
                    cur, jnp.min(d, axis=0, keepdims=True))                   # per y
                return mins

            mins = lax.fori_loop(0, n_y, body_y,
                                 jnp.full((tx, 1), jnp.inf, jnp.float32))
            if padded:
                mins = jnp.where(sub_valid, mins, 0.0)
            return acc_xy + jnp.sum(mins)

        acc_xy = lax.fori_loop(0, n_x, body_x, jnp.float32(0.0))
        yx = yx_ref[...]
        if padded:
            yx = jnp.where(yx_valid, yx, 0.0)
        return (acc_xy + jnp.sum(yx)) * inv_n

    def row_for(i):
        # Symmetry: only j > i is computed; diagonal is 0; the lower triangle is
        # mirrored in the wrapper.
        def body_j(j, row):
            return jnp.where(lane_b == j, chamfer_pair(i, j), row)
        return lax.fori_loop(i + 1, batch, body_j,
                             jnp.zeros((1, batch), jnp.float32))

    out_ref[0, 0:1, :] = row_for(g)                  # row g
    out_ref[0, 1:2, :] = row_for(batch - 1 - g)      # row B-1-g (balances the triangle)


def pairwise_chamfer_distance(pc):
    """pc: (B, N, 3) float32 -> (B, B) float32 symmetric chamfer matrix."""
    pc = pc.astype(jnp.float32)
    B, N, _ = pc.shape
    n_pad, tx, ty = _tiles(N)
    n_y = n_pad // ty
    pad = n_pad - N

    planes = jnp.transpose(pc, (2, 0, 1))            # (3, B, N): points on lanes
    if pad:
        planes = jnp.pad(planes, ((0, 0), (0, 0), (0, pad)))
    planes4 = planes.reshape(3, B, n_y, ty)          # y-chunk axis -> sublanes (no pad waste)
    planes_t = jnp.transpose(planes, (0, 2, 1))      # (3, Np, B): points on sublanes

    h = (B + 1) // 2
    kernel = functools.partial(_chamfer_rows_kernel, n_real=N, n_pad=n_pad,
                               batch=B, tx=tx, ty=ty)
    out3 = pl.pallas_call(
        kernel,
        out_shape=jax.ShapeDtypeStruct((h, 2, B), jnp.float32),
        grid=(h,),
        in_specs=[
            # Grid-invariant resident blocks (constant index_map -> DMA'd once).
            pl.BlockSpec((3, B, n_y, ty), lambda g: (0, 0, 0, 0)),
            pl.BlockSpec((3, n_pad, B), lambda g: (0, 0, 0)),
        ],
        out_specs=pl.BlockSpec((1, 2, B), lambda g: (g, 0, 0)),   # lane-dense row pair
        scratch_shapes=[pltpu.VMEM((n_y, ty), jnp.float32)],      # running min_yx
        compiler_params=pltpu.CompilerParams(
            dimension_semantics=("parallel",),                    # v7x: 2 TCs split rows
            vmem_limit_bytes=_vmem_limit_bytes(B, n_pad, n_y, tx, ty),
        ),
    )(planes4, planes_t)

    idx_a = jnp.arange(h)
    idx_b = (B - 1) - idx_a
    upper = jnp.zeros((B, B), jnp.float32)
    upper = upper.at[idx_a].set(out3[:, 0, :]).at[idx_b].set(out3[:, 1, :])
    return upper + upper.T                            # chamfer distance is symmetric


# --------------------------------------------------------------------------------
# Multi-similarity mining + loss on the tiny (B, B) matrix, in plain jnp.  The
# torch variable-length boolean indexing is expressed with masked reductions,
# which is mathematically identical; masking is applied BEFORE exp.
# --------------------------------------------------------------------------------
def _ms_loss(sim, delta, margin):
    B = sim.shape[0]
    off_diag = ~jnp.eye(B, dtype=bool)
    pos_mask = (sim < delta) & off_diag
    neg_mask = (sim >= delta) & off_diag
    n_pos = jnp.sum(pos_mask)
    n_neg = jnp.sum(neg_mask)

    neg_max = jnp.max(jnp.where(neg_mask, sim, -jnp.inf))
    pos_keep = pos_mask & ((sim - margin) < neg_max)
    pos_min = jnp.min(jnp.where(pos_keep, sim, jnp.inf))
    neg_keep = neg_mask & ((sim + margin) > pos_min)
    n_pos2 = jnp.sum(pos_keep)
    n_neg2 = jnp.sum(neg_keep)

    pos_sum = jnp.sum(jnp.exp(jnp.where(pos_keep, -SCALE_POS * (sim - THRESH), -jnp.inf)))
    neg_sum = jnp.sum(jnp.exp(jnp.where(neg_keep, SCALE_NEG * (sim - THRESH), -jnp.inf)))
    pos_loss = (1.0 / SCALE_POS) * jnp.log1p(pos_sum)
    neg_loss = (1.0 / SCALE_NEG) * jnp.log1p(neg_sum)

    valid = (n_pos > 0) & (n_neg > 0) & (n_pos2 > 0) & (n_neg2 > 0)
    return jnp.where(valid, pos_loss + neg_loss, jnp.float32(0.0))


@functools.partial(jax.jit, static_argnames=("delta", "margin"))
def cdmsl_forward(features, point_clouds, delta=0.03, margin=0.001):
    del features  # unused, exactly as in the torch module's forward
    sim = pairwise_chamfer_distance(point_clouds)
    loss = _ms_loss(sim, float(delta), float(margin))
    return loss, sim  # sim returned for testing convenience; torch returns loss only


# --------------------------------------------------------------------------------
# Pure-numpy reference (mirrors the torch forward) for a correctness check.
# --------------------------------------------------------------------------------
def _reference(pc, delta=0.03, margin=0.001):
    pc = np.asarray(pc, dtype=np.float64)
    B = pc.shape[0]
    sim = np.zeros((B, B), np.float64)
    for i in range(B):
        for j in range(B):
            d = ((pc[j][:, None, :] - pc[i][None, :, :]) ** 2).sum(-1)
            sim[i, j] = d.min(1).mean() + d.min(0).mean()
    off = ~np.eye(B, dtype=bool)
    pos = sim[(sim < delta) & off]
    neg = sim[(sim >= delta) & off]
    if len(pos) < 1 or len(neg) < 1:
        return 0.0, sim
    pos = pos[pos - margin < neg.max()]
    if len(pos) < 1:
        return 0.0, sim
    neg = neg[neg + margin > pos.min()]
    if len(neg) < 1 or len(pos) < 1:
        return 0.0, sim
    pos_loss = (1.0 / SCALE_POS) * np.log(1 + np.sum(np.exp(-SCALE_POS * (pos - THRESH))))
    neg_loss = (1.0 / SCALE_NEG) * np.log(1 + np.sum(np.exp(SCALE_NEG * (neg - THRESH))))
    return float(pos_loss + neg_loss), sim


if __name__ == "__main__":
    key = jax.random.PRNGKey(0)
    B, N = 4, 8
    k1, k2, k3 = jax.random.split(key, 3)
    base = jax.random.uniform(k1, (2, N, 3), dtype=jnp.float32)
    noise = 0.005 * jax.random.normal(k2, (2, N, 3), dtype=jnp.float32)
    # clouds 1 and 3 are near-duplicates of 0 and 2 -> some positive and negative pairs
    point_clouds = jnp.concatenate(
        [base[0:1], base[0:1] + noise[0:1], base[1:2], base[1:2] + noise[1:2]], axis=0
    )  # (4, 8, 3)
    features = jax.random.normal(k3, (B, 32), dtype=jnp.float32)  # unused by forward

    loss, sim = cdmsl_forward(features, point_clouds)
    jax.block_until_ready(loss)

    ref_loss, ref_sim = _reference(np.array(point_clouds))
    assert np.allclose(np.array(sim), ref_sim, atol=1e-4, rtol=1e-4), (np.array(sim), ref_sim)
    assert np.allclose(float(loss), ref_loss, atol=1e-4, rtol=1e-3), (float(loss), ref_loss)

    print("KERNEL_OK")
</pallas_src>

<mosaic_0001>
module attributes {stable_mosaic.version = 11 : i64} {
  func.func @_chamfer_rows_kernel(%arg0: i32, %arg1: memref<3x4x1x8xf32, #tpu.memory_space<vmem>>, %arg2: memref<3x8x4xf32, #tpu.memory_space<vmem>>, %arg3: memref<1x2x4xf32, #tpu.memory_space<vmem>>, %arg4: memref<1x8xf32, #tpu.memory_space<vmem>>) attributes {dimension_semantics = [#tpu.dimension_semantics<parallel>], iteration_bounds = array<i64: 2>, scalar_prefetch = 0 : i64, scratch_operands = 1 : i64, tpu.core_type = #tpu.core_type<tc>, window_params = [{pipeline_mode = #tpu.pipeline_mode<synchronous>, transform_indices = @transform_0, window_bounds = array<i64: 3, 4, 1, 8>}, {pipeline_mode = #tpu.pipeline_mode<synchronous>, transform_indices = @transform_1, window_bounds = array<i64: 3, 8, 4>}, {transform_indices = @transform_2, window_bounds = array<i64: 1, 2, 4>}]} {
    %0 = tpu.iota {dimensions = array<i32: 1>} : vector<1x4xi32>
    %c1_i32 = arith.constant 1 : i32
    %1 = arith.addi %arg0, %c1_i32 : i32
    %cst = arith.constant 0.000000e+00 : f32
    %2 = vector.broadcast %cst : f32 to vector<1x4xf32>
    %cst_0 = arith.constant 1.250000e-01 : f32
    %c4_i32 = arith.constant 4 : i32
    %3 = arith.subi %c4_i32, %1 : i32
    %4 = arith.addi %1, %3 : i32
    %c1_i32_1 = arith.constant 1 : i32
    %5 = scf.for %arg5 = %1 to %4 step %c1_i32_1 iter_args(%arg6 = %2) -> (vector<1x4xf32>)  : i32 {
      %18 = vector.broadcast %arg5 : i32 to vector<1x4xi32>
      %19 = arith.cmpi eq, %0, %18 : vector<1x4xi32>
      %cst_11 = arith.constant 0x7F800000 : f32
      %20 = vector.broadcast %cst_11 : f32 to vector<1x8xf32>
      %c0_12 = arith.constant 0 : index
      %c0_13 = arith.constant 0 : index
      %21 = vector.load %arg4[%c0_12, %c0_13] : memref<1x8xf32, #tpu.memory_space<vmem>>, vector<1x8xf32>
      tpu.vector_store %arg4[%c0_12, %c0_13], %20 {strides = array<i32>} : memref<1x8xf32, #tpu.memory_space<vmem>>, vector<1x8xf32>,
      %cst_14 = arith.constant 0.000000e+00 : f32
      %c0_i32 = arith.constant 0 : i32
      %c8_i32 = arith.constant 8 : i32
      %22 = arith.muli %c0_i32, %c8_i32 : i32
      %23 = tpu.assume_multiple %22, 8 : i32
      %c0_15 = arith.constant 0 : index
      %24 = arith.index_cast %23 : i32 to index
      %c0_16 = arith.constant 0 : index
      %25 = vector.load %arg2[%c0_15, %24, %c0_16] : memref<3x8x4xf32, #tpu.memory_space<vmem>>, vector<1x8x4xf32>
      %26 = vector.shape_cast %25 : vector<1x8x4xf32> to vector<8x4xf32>
      %27 = vector.broadcast %arg0 : i32 to vector<1x4xi32>
      %28 = arith.cmpi eq, %0, %27 : vector<1x4xi32>
      %cst_17 = arith.constant 0.000000e+00 : f32
      %29 = vector.shape_cast %28 : vector<1x4xi1> to vector<1x4xi1>
      %30 = vector.broadcast %29 : vector<1x4xi1> to vector<8x4xi1>
      %31 = vector.broadcast %cst_17 : f32 to vector<8x4xf32>
      %32 = arith.select %30, %26, %31 : vector<8x4xi1>, vector<8x4xf32>
      %cst_18 = arith.constant dense<0.000000e+00> : vector<8xf32>
      %33 = vector.multi_reduction <add>, %32, %cst_18 [1] : vector<8x4xf32> to vector<8xf32>
      %34 = vector.shape_cast %33 : vector<8xf32> to vector<8x1xf32>
      %c1_19 = arith.constant 1 : index
      %35 = arith.index_cast %23 : i32 to index
      %c0_20 = arith.constant 0 : index
      %36 = vector.load %arg2[%c1_19, %35, %c0_20] : memref<3x8x4xf32, #tpu.memory_space<vmem>>, vector<1x8x4xf32>
      %37 = vector.shape_cast %36 : vector<1x8x4xf32> to vector<8x4xf32>
      %38 = vector.broadcast %arg0 : i32 to vector<1x4xi32>
      %39 = arith.cmpi eq, %0, %38 : vector<1x4xi32>
      %cst_21 = arith.constant 0.000000e+00 : f32
      %40 = vector.shape_cast %39 : vector<1x4xi1> to vector<1x4xi1>
      %41 = vector.broadcast %40 : vector<1x4xi1> to vector<8x4xi1>
      %42 = vector.broadcast %cst_21 : f32 to vector<8x4xf32>
      %43 = arith.select %41, %37, %42 : vector<8x4xi1>, vector<8x4xf32>
      %cst_22 = arith.constant dense<0.000000e+00> : vector<8xf32>
      %44 = vector.multi_reduction <add>, %43, %cst_22 [1] : vector<8x4xf32> to vector<8xf32>
      %45 = vector.shape_cast %44 : vector<8xf32> to vector<8x1xf32>
      %c2 = arith.constant 2 : index
      %46 = arith.index_cast %23 : i32 to index
      %c0_23 = arith.constant 0 : index
      %47 = vector.load %arg2[%c2, %46, %c0_23] : memref<3x8x4xf32, #tpu.memory_space<vmem>>, vector<1x8x4xf32>
      %48 = vector.shape_cast %47 : vector<1x8x4xf32> to vector<8x4xf32>
      %49 = vector.broadcast %arg0 : i32 to vector<1x4xi32>
      %50 = arith.cmpi eq, %0, %49 : vector<1x4xi32>
      %cst_24 = arith.constant 0.000000e+00 : f32
      %51 = vector.shape_cast %50 : vector<1x4xi1> to vector<1x4xi1>
      %52 = vector.broadcast %51 : vector<1x4xi1> to vector<8x4xi1>
      %53 = vector.broadcast %cst_24 : f32 to vector<8x4xf32>
      %54 = arith.select %52, %48, %53 : vector<8x4xi1>, vector<8x4xf32>
      %cst_25 = arith.constant dense<0.000000e+00> : vector<8xf32>
      %55 = vector.multi_reduction <add>, %54, %cst_25 [1] : vector<8x4xf32> to vector<8xf32>
      %56 = vector.shape_cast %55 : vector<8xf32> to vector<8x1xf32>
      %cst_26 = arith.constant 0x7F800000 : f32
      %57 = vector.broadcast %cst_26 : f32 to vector<8x1xf32>
      %c0_i32_27 = arith.constant 0 : i32
      %c0_28 = arith.constant 0 : index
      %58 = arith.index_cast %arg5 : i32 to index
      %59 = arith.index_cast %c0_i32_27 : i32 to index
      %c0_29 = arith.constant 0 : index
      %60 = vector.load %arg1[%c0_28, %58, %59, %c0_29] : memref<3x4x1x8xf32, #tpu.memory_space<vmem>>, vector<1x1x1x8xf32>
      %61 = vector.shape_cast %60 : vector<1x1x1x8xf32> to vector<1x1x8xf32>
      %62 = vector.shape_cast %61 : vector<1x1x8xf32> to vector<1x8xf32>
      %c1_30 = arith.constant 1 : index
      %63 = arith.index_cast %arg5 : i32 to index
      %64 = arith.index_cast %c0_i32_27 : i32 to index
      %c0_31 = arith.constant 0 : index
      %65 = vector.load %arg1[%c1_30, %63, %64, %c0_31] : memref<3x4x1x8xf32, #tpu.memory_space<vmem>>, vector<1x1x1x8xf32>
      %66 = vector.shape_cast %65 : vector<1x1x1x8xf32> to vector<1x1x8xf32>
      %67 = vector.shape_cast %66 : vector<1x1x8xf32> to vector<1x8xf32>
      %c2_32 = arith.constant 2 : index
      %68 = arith.index_cast %arg5 : i32 to index
      %69 = arith.index_cast %c0_i32_27 : i32 to index
      %c0_33 = arith.constant 0 : index
      %70 = vector.load %arg1[%c2_32, %68, %69, %c0_33] : memref<3x4x1x8xf32, #tpu.memory_space<vmem>>, vector<1x1x1x8xf32>
      %71 = vector.shape_cast %70 : vector<1x1x1x8xf32> to vector<1x1x8xf32>
      %72 = vector.shape_cast %71 : vector<1x1x8xf32> to vector<1x8xf32>
      %73 = vector.broadcast %34 : vector<8x1xf32> to vector<8x8xf32>
      %74 = vector.broadcast %62 : vector<1x8xf32> to vector<8x8xf32>
      %75 = arith.subf %73, %74 : vector<8x8xf32>
      %76 = vector.broadcast %45 : vector<8x1xf32> to vector<8x8xf32>
      %77 = vector.broadcast %67 : vector<1x8xf32> to vector<8x8xf32>
      %78 = arith.subf %76, %77 : vector<8x8xf32>
      %79 = vector.broadcast %56 : vector<8x1xf32> to vector<8x8xf32>
      %80 = vector.broadcast %72 : vector<1x8xf32> to vector<8x8xf32>
      %81 = arith.subf %79, %80 : vector<8x8xf32>
      %82 = arith.mulf %75, %75 : vector<8x8xf32>
      %83 = arith.mulf %78, %78 : vector<8x8xf32>
      %84 = arith.addf %82, %83 : vector<8x8xf32>
      %85 = arith.mulf %81, %81 : vector<8x8xf32>
      %86 = arith.addf %84, %85 : vector<8x8xf32>
      %cst_34 = arith.constant dense<0x7F800000> : vector<8xf32>
      %87 = vector.multi_reduction <minimumf>, %86, %cst_34 [1] : vector<8x8xf32> to vector<8xf32>
      %88 = vector.shape_cast %87 : vector<8xf32> to vector<8x1xf32>
      %89 = arith.minimumf %57, %88 : vector<8x1xf32>
      %90 = arith.index_cast %c0_i32_27 : i32 to index
      %c0_35 = arith.constant 0 : index
      %91 = vector.load %arg4[%90, %c0_35] : memref<1x8xf32, #tpu.memory_space<vmem>>, vector<1x8xf32>
      %cst_36 = arith.constant dense<0x7F800000> : vector<8xf32>
      %92 = vector.multi_reduction <minimumf>, %86, %cst_36 [0] : vector<8x8xf32> to vector<8xf32>
      %93 = vector.shape_cast %92 : vector<8xf32> to vector<1x8xf32>
      %94 = arith.minimumf %91, %93 : vector<1x8xf32>
      %95 = arith.index_cast %c0_i32_27 : i32 to index
      %c0_37 = arith.constant 0 : index
      %96 = vector.load %arg4[%95, %c0_37] : memref<1x8xf32, #tpu.memory_space<vmem>>, vector<1x8xf32>
      tpu.vector_store %arg4[%95, %c0_37], %94 {strides = array<i32>} : memref<1x8xf32, #tpu.memory_space<vmem>>, vector<1x8xf32>,
      %c1_i32_38 = arith.constant 1 : i32
      %97 = vector.shape_cast %89 : vector<8x1xf32> to vector<1x8x1xf32>
      %cst_39 = arith.constant dense<0.000000e+00> : vector<1xf32>
      %98 = vector.multi_reduction <add>, %97, %cst_39 [1, 2] : vector<1x8x1xf32> to vector<1xf32>
      %99 = vector.shape_cast %98 : vector<1xf32> to vector<1x1x1xf32>
      %100 = vector.extract %99[0, 0, 0] : f32 from vector<1x1x1xf32>
      %101 = arith.addf %cst_14, %100 : f32
      %c1_i32_40 = arith.constant 1 : i32
      %c0_41 = arith.constant 0 : index
      %c0_42 = arith.constant 0 : index
      %102 = vector.load %arg4[%c0_41, %c0_42] : memref<1x8xf32, #tpu.memory_space<vmem>>, vector<1x8xf32>
      %103 = vector.shape_cast %102 : vector<1x8xf32> to vector<1x1x8xf32>
      %cst_43 = arith.constant dense<0.000000e+00> : vector<1xf32>
      %104 = vector.multi_reduction <add>, %103, %cst_43 [1, 2] : vector<1x1x8xf32> to vector<1xf32>
      %105 = vector.shape_cast %104 : vector<1xf32> to vector<1x1x1xf32>
      %106 = vector.extract %105[0, 0, 0] : f32 from vector<1x1x1xf32>
      %107 = arith.addf %101, %106 : f32
      %108 = arith.mulf %107, %cst_0 : f32
      %109 = vector.broadcast %108 : f32 to vector<1x4xf32>
      %110 = arith.select %19, %109, %arg6 : vector<1x4xi1>, vector<1x4xf32>
      scf.yield %110 : vector<1x4xf32>
    }
    %c0 = arith.constant 0 : index
    %c0_2 = arith.constant 0 : index
    %c0_3 = arith.constant 0 : index
    %6 = vector.load %arg3[%c0, %c0_2, %c0_3] : memref<1x2x4xf32, #tpu.memory_space<vmem>>, vector<1x1x4xf32>
    %7 = vector.shape_cast %6 : vector<1x1x4xf32> to vector<1x4xf32>
    %8 = vector.shape_cast %5 : vector<1x4xf32> to vector<1x1x4xf32>
    tpu.vector_store %arg3[%c0, %c0_2, %c0_3], %8 {strides = array<i32>} : memref<1x2x4xf32, #tpu.memory_space<vmem>>, vector<1x1x4xf32>,
    %c3_i32 = arith.constant 3 : i32
    %9 = arith.subi %c3_i32, %arg0 : i32
    %c1_i32_4 = arith.constant 1 : i32
    %10 = arith.addi %9, %c1_i32_4 : i32
    %cst_5 = arith.constant 0.000000e+00 : f32
    %11 = vector.broadcast %cst_5 : f32 to vector<1x4xf32>
    %cst_6 = arith.constant 1.250000e-01 : f32
    %c4_i32_7 = arith.constant 4 : i32
    %12 = arith.subi %c4_i32_7, %10 : i32
    %13 = arith.addi %10, %12 : i32
    %c1_i32_8 = arith.constant 1 : i32
    %14 = scf.for %arg5 = %10 to %13 step %c1_i32_8 iter_args(%arg6 = %11) -> (vector<1x4xf32>)  : i32 {
      %18 = vector.broadcast %arg5 : i32 to vector<1x4xi32>
      %19 = arith.cmpi eq, %0, %18 : vector<1x4xi32>
      %cst_11 = arith.constant 0x7F800000 : f32
      %20 = vector.broadcast %cst_11 : f32 to vector<1x8xf32>
      %c0_12 = arith.constant 0 : index
      %c0_13 = arith.constant 0 : index
      %21 = vector.load %arg4[%c0_12, %c0_13] : memref<1x8xf32, #tpu.memory_space<vmem>>, vector<1x8xf32>
      tpu.vector_store %arg4[%c0_12, %c0_13], %20 {strides = array<i32>} : memref<1x8xf32, #tpu.memory_space<vmem>>, vector<1x8xf32>,
      %cst_14 = arith.constant 0.000000e+00 : f32
      %c0_i32 = arith.constant 0 : i32
      %c8_i32 = arith.constant 8 : i32
      %22 = arith.muli %c0_i32, %c8_i32 : i32
      %23 = tpu.assume_multiple %22, 8 : i32
      %c0_15 = arith.constant 0 : index
      %24 = arith.index_cast %23 : i32 to index
      %c0_16 = arith.constant 0 : index
      %25 = vector.load %arg2[%c0_15, %24, %c0_16] : memref<3x8x4xf32, #tpu.memory_space<vmem>>, vector<1x8x4xf32>
      %26 = vector.shape_cast %25 : vector<1x8x4xf32> to vector<8x4xf32>
      %27 = vector.broadcast %9 : i32 to vector<1x4xi32>
      %28 = arith.cmpi eq, %0, %27 : vector<1x4xi32>
      %cst_17 = arith.constant 0.000000e+00 : f32
      %29 = vector.shape_cast %28 : vector<1x4xi1> to vector<1x4xi1>
      %30 = vector.broadcast %29 : vector<1x4xi1> to vector<8x4xi1>
      %31 = vector.broadcast %cst_17 : f32 to vector<8x4xf32>
      %32 = arith.select %30, %26, %31 : vector<8x4xi1>, vector<8x4xf32>
      %cst_18 = arith.constant dense<0.000000e+00> : vector<8xf32>
      %33 = vector.multi_reduction <add>, %32, %cst_18 [1] : vector<8x4xf32> to vector<8xf32>
      %34 = vector.shape_cast %33 : vector<8xf32> to vector<8x1xf32>
      %c1_19 = arith.constant 1 : index
      %35 = arith.index_cast %23 : i32 to index
      %c0_20 = arith.constant 0 : index
      %36 = vector.load %arg2[%c1_19, %35, %c0_20] : memref<3x8x4xf32, #tpu.memory_space<vmem>>, vector<1x8x4xf32>
      %37 = vector.shape_cast %36 : vector<1x8x4xf32> to vector<8x4xf32>
      %38 = vector.broadcast %9 : i32 to vector<1x4xi32>
      %39 = arith.cmpi eq, %0, %38 : vector<1x4xi32>
      %cst_21 = arith.constant 0.000000e+00 : f32
      %40 = vector.shape_cast %39 : vector<1x4xi1> to vector<1x4xi1>
      %41 = vector.broadcast %40 : vector<1x4xi1> to vector<8x4xi1>
      %42 = vector.broadcast %cst_21 : f32 to vector<8x4xf32>
      %43 = arith.select %41, %37, %42 : vector<8x4xi1>, vector<8x4xf32>
      %cst_22 = arith.constant dense<0.000000e+00> : vector<8xf32>
      %44 = vector.multi_reduction <add>, %43, %cst_22 [1] : vector<8x4xf32> to vector<8xf32>
      %45 = vector.shape_cast %44 : vector<8xf32> to vector<8x1xf32>
      %c2 = arith.constant 2 : index
      %46 = arith.index_cast %23 : i32 to index
      %c0_23 = arith.constant 0 : index
      %47 = vector.load %arg2[%c2, %46, %c0_23] : memref<3x8x4xf32, #tpu.memory_space<vmem>>, vector<1x8x4xf32>
      %48 = vector.shape_cast %47 : vector<1x8x4xf32> to vector<8x4xf32>
      %49 = vector.broadcast %9 : i32 to vector<1x4xi32>
      %50 = arith.cmpi eq, %0, %49 : vector<1x4xi32>
      %cst_24 = arith.constant 0.000000e+00 : f32
      %51 = vector.shape_cast %50 : vector<1x4xi1> to vector<1x4xi1>
      %52 = vector.broadcast %51 : vector<1x4xi1> to vector<8x4xi1>
      %53 = vector.broadcast %cst_24 : f32 to vector<8x4xf32>
      %54 = arith.select %52, %48, %53 : vector<8x4xi1>, vector<8x4xf32>
      %cst_25 = arith.constant dense<0.000000e+00> : vector<8xf32>
      %55 = vector.multi_reduction <add>, %54, %cst_25 [1] : vector<8x4xf32> to vector<8xf32>
      %56 = vector.shape_cast %55 : vector<8xf32> to vector<8x1xf32>
      %cst_26 = arith.constant 0x7F800000 : f32
      %57 = vector.broadcast %cst_26 : f32 to vector<8x1xf32>
      %c0_i32_27 = arith.constant 0 : i32
      %c0_28 = arith.constant 0 : index
      %58 = arith.index_cast %arg5 : i32 to index
      %59 = arith.index_cast %c0_i32_27 : i32 to index
      %c0_29 = arith.constant 0 : index
      %60 = vector.load %arg1[%c0_28, %58, %59, %c0_29] : memref<3x4x1x8xf32, #tpu.memory_space<vmem>>, vector<1x1x1x8xf32>
      %61 = vector.shape_cast %60 : vector<1x1x1x8xf32> to vector<1x1x8xf32>
      %62 = vector.shape_cast %61 : vector<1x1x8xf32> to vector<1x8xf32>
      %c1_30 = arith.constant 1 : index
      %63 = arith.index_cast %arg5 : i32 to index
      %64 = arith.index_cast %c0_i32_27 : i32 to index
      %c0_31 = arith.constant 0 : index
      %65 = vector.load %arg1[%c1_30, %63, %64, %c0_31] : memref<3x4x1x8xf32, #tpu.memory_space<vmem>>, vector<1x1x1x8xf32>
      %66 = vector.shape_cast %65 : vector<1x1x1x8xf32> to vector<1x1x8xf32>
      %67 = vector.shape_cast %66 : vector<1x1x8xf32> to vector<1x8xf32>
      %c2_32 = arith.constant 2 : index
      %68 = arith.index_cast %arg5 : i32 to index
      %69 = arith.index_cast %c0_i32_27 : i32 to index
      %c0_33 = arith.constant 0 : index
      %70 = vector.load %arg1[%c2_32, %68, %69, %c0_33] : memref<3x4x1x8xf32, #tpu.memory_space<vmem>>, vector<1x1x1x8xf32>
      %71 = vector.shape_cast %70 : vector<1x1x1x8xf32> to vector<1x1x8xf32>
      %72 = vector.shape_cast %71 : vector<1x1x8xf32> to vector<1x8xf32>
      %73 = vector.broadcast %34 : vector<8x1xf32> to vector<8x8xf32>
      %74 = vector.broadcast %62 : vector<1x8xf32> to vector<8x8xf32>
      %75 = arith.subf %73, %74 : vector<8x8xf32>
      %76 = vector.broadcast %45 : vector<8x1xf32> to vector<8x8xf32>
      %77 = vector.broadcast %67 : vector<1x8xf32> to vector<8x8xf32>
      %78 = arith.subf %76, %77 : vector<8x8xf32>
      %79 = vector.broadcast %56 : vector<8x1xf32> to vector<8x8xf32>
      %80 = vector.broadcast %72 : vector<1x8xf32> to vector<8x8xf32>
      %81 = arith.subf %79, %80 : vector<8x8xf32>
      %82 = arith.mulf %75, %75 : vector<8x8xf32>
      %83 = arith.mulf %78, %78 : vector<8x8xf32>
      %84 = arith.addf %82, %83 : vector<8x8xf32>
      %85 = arith.mulf %81, %81 : vector<8x8xf32>
      %86 = arith.addf %84, %85 : vector<8x8xf32>
      %cst_34 = arith.constant dense<0x7F800000> : vector<8xf32>
      %87 = vector.multi_reduction <minimumf>, %86, %cst_34 [1] : vector<8x8xf32> to vector<8xf32>
      %88 = vector.shape_cast %87 : vector<8xf32> to vector<8x1xf32>
      %89 = arith.minimumf %57, %88 : vector<8x1xf32>
      %90 = arith.index_cast %c0_i32_27 : i32 to index
      %c0_35 = arith.constant 0 : index
      %91 = vector.load %arg4[%90, %c0_35] : memref<1x8xf32, #tpu.memory_space<vmem>>, vector<1x8xf32>
      %cst_36 = arith.constant dense<0x7F800000> : vector<8xf32>
      %92 = vector.multi_reduction <minimumf>, %86, %cst_36 [0] : vector<8x8xf32> to vector<8xf32>
      %93 = vector.shape_cast %92 : vector<8xf32> to vector<1x8xf32>
      %94 = arith.minimumf %91, %93 : vector<1x8xf32>
      %95 = arith.index_cast %c0_i32_27 : i32 to index
      %c0_37 = arith.constant 0 : index
      %96 = vector.load %arg4[%95, %c0_37] : memref<1x8xf32, #tpu.memory_space<vmem>>, vector<1x8xf32>
      tpu.vector_store %arg4[%95, %c0_37], %94 {strides = array<i32>} : memref<1x8xf32, #tpu.memory_space<vmem>>, vector<1x8xf32>,
      %c1_i32_38 = arith.constant 1 : i32
      %97 = vector.shape_cast %89 : vector<8x1xf32> to vector<1x8x1xf32>
      %cst_39 = arith.constant dense<0.000000e+00> : vector<1xf32>
      %98 = vector.multi_reduction <add>, %97, %cst_39 [1, 2] : vector<1x8x1xf32> to vector<1xf32>
      %99 = vector.shape_cast %98 : vector<1xf32> to vector<1x1x1xf32>
      %100 = vector.extract %99[0, 0, 0] : f32 from vector<1x1x1xf32>
      %101 = arith.addf %cst_14, %100 : f32
      %c1_i32_40 = arith.constant 1 : i32
      %c0_41 = arith.constant 0 : index
      %c0_42 = arith.constant 0 : index
      %102 = vector.load %arg4[%c0_41, %c0_42] : memref<1x8xf32, #tpu.memory_space<vmem>>, vector<1x8xf32>
      %103 = vector.shape_cast %102 : vector<1x8xf32> to vector<1x1x8xf32>
      %cst_43 = arith.constant dense<0.000000e+00> : vector<1xf32>
      %104 = vector.multi_reduction <add>, %103, %cst_43 [1, 2] : vector<1x1x8xf32> to vector<1xf32>
      %105 = vector.shape_cast %104 : vector<1xf32> to vector<1x1x1xf32>
      %106 = vector.extract %105[0, 0, 0] : f32 from vector<1x1x1xf32>
      %107 = arith.addf %101, %106 : f32
      %108 = arith.mulf %107, %cst_6 : f32
      %109 = vector.broadcast %108 : f32 to vector<1x4xf32>
      %110 = arith.select %19, %109, %arg6 : vector<1x4xi1>, vector<1x4xf32>
      scf.yield %110 : vector<1x4xf32>
    }
    %c0_9 = arith.constant 0 : index
    %c1 = arith.constant 1 : index
    %c0_10 = arith.constant 0 : index
    %15 = vector.load %arg3[%c0_9, %c1, %c0_10] : memref<1x2x4xf32, #tpu.memory_space<vmem>>, vector<1x1x4xf32>
    %16 = vector.shape_cast %15 : vector<1x1x4xf32> to vector<1x4xf32>
    %17 = vector.shape_cast %14 : vector<1x4xf32> to vector<1x1x4xf32>
    tpu.vector_store %arg3[%c0_9, %c1, %c0_10], %17 {strides = array<i32>} : memref<1x2x4xf32, #tpu.memory_space<vmem>>, vector<1x1x4xf32>,
    return
  }
  func.func @transform_0(%arg0: i32) -> (i32, i32, i32, i32) {
    %c0_i32 = arith.constant 0 : i32
    %c0_i32_0 = arith.constant 0 : i32
    %c0_i32_1 = arith.constant 0 : i32
    %c0_i32_2 = arith.constant 0 : i32
    %c0_i32_3 = arith.constant 0 : i32
    return %c0_i32, %c0_i32_0, %c0_i32_1, %c0_i32_2 : i32, i32, i32, i32
  }
  func.func @transform_1(%arg0: i32) -> (i32, i32, i32) {
    %c0_i32 = arith.constant 0 : i32
    %c0_i32_0 = arith.constant 0 : i32
    %c0_i32_1 = arith.constant 0 : i32
    %c0_i32_2 = arith.constant 0 : i32
    return %c0_i32, %c0_i32_0, %c0_i32_1 : i32, i32, i32
  }
  func.func @transform_2(%arg0: i32) -> (i32, i32, i32) {
    %c0_i32 = arith.constant 0 : i32
    %c0_i32_0 = arith.constant 0 : i32
    %c0_i32_1 = arith.constant 0 : i32
    return %arg0, %c0_i32, %c0_i32_0 : i32, i32, i32
  }
}

</mosaic_0001>

<bundles_post_ra>
// kernel: cdmsl_forward.1
= control target key start
LH: loop header
LB: loop body
LE: loop exit
PB: predicated region body
PF: predicated region fallthrough
CT: control target
= control target key end

     0   :  { %s579_s9 = smov 0   ;;  %s691_s0 = inlined_call_operand.vmem [shape: f32[3,4,1,8], index: 0, kind: input, shape index: {}]   ;;  %s692_s1 = inlined_call_operand.vmem [shape: f32[3,8,4], index: 1, kind: input, shape index: {}]   ;;  %s693_s2 = inlined_call_operand.vmem [shape: f32[2,2,4], index: 2, kind: output, shape index: {}]  }
   0x1 LB: > { %s585_s10 = sadd.s32 4294967295, %s536_s9   ;;  %p422_p0 = scmp.ge.s32.totalorder %s536_s9, 1  ;;  %s536_s9 = sphi %s579_s9, %s12_s9  }
   0x2   : > { %p102_p1 = scmp.lt.s32.totalorder %s536_s9, 3 }
   0x4   : > { %p103_p2 = pnand %p422_p0, %p102_p1 }
   0x5   : > { %p118_p3 = scmp.lt.s32.totalorder (!%p103_p2), %s585_s10, 1  ;;  %v122_v0 = vlaneseq (!%p103_p2)  ;;  %s124_s11 = sadd.s32 (!%p103_p2), 1, %s585_s10   ;;  %v599_v2 = vmov (!%p103_p2), 0.0  }
   0x6   : > { %106 = sbr.rel (%p103_p2) target bundleno = 1060 (0x424), region = 28  ;;  %p390_p4 = scmp.ge.s32.totalorder (!%p103_p2), %s124_s11, 4 }
   0x7   : > { %v592_v1 = vand.u32 (!%p103_p2), 127, %v122_v0 }
   0xd   : > { %s119_s12 = scalar_select %p118_p3, %s585_s10, 1 }
   0xe   : > { %392 = sbr.rel (%p390_p4) target bundleno = 535 (0x217), region = 73  ;;  %v601_v3 = vmov (!%p390_p4), 0.0  }
   0xf   : > { %s423_s13 = sshll.u32 %s119_s12, 1 }
  0x10   : > { %s597_s16 = scalar_lea.vmem %s693_s2, %s423_s13 }
  0x15 LB: >> { %v136_v4 = vld [vmem:[%s692_s1] sm:$0xff]  ;;  %v137_v5 = vstv %s585_s10  ;;  %vm142_vm0 = vcmask 31744   ;;  %v424_v6 = vld [vmem:[%s692_s1 + $0x8] sm:$0xff]  ;;  %v425_v7 = vld [vmem:[%s692_s1 + $0x10] sm:$0xff]  ;;  %vm134_vm2 = vcmask 57344   ;;  %v562_v14 = vmov inf   ;;  %s160_s25 = scalar_lea.vmem %s691_s0, %s544_s11  ;;  %s544_s11 = sphi %s124_s11, %s128_s11   ;;  %v540_v3 = vphi %v601_v3, %v694_v3  }
  0x16   : >> { %vm138_vm1 = vcmp.eq.s32.totalorder %v592_v1, %v137_v5  ;;  %135 = vst.msk [vmem:[#allocation2] sm:$0x1] %vm134_vm2, %v562_v14  ;;  %v428_v16 = vld [vmem:[%s160_s25] ss:$0 sm:$0xff]  ;;  %v430_v18 = vld [vmem:[%s160_s25 + $0x8] ss:$0 sm:$0xff]  ;;  %v132_v56 = vstv %s544_s11 }
  0x17   : >> { %v141_v8 = vsel %vm138_vm1, %v136_v4, 0.0  ;;  %v149_v9 = vsel %vm138_vm1, %v424_v6, 0.0  ;;  %v156_v10 = vsel %vm138_vm1, %v425_v7, 0.0  ;;  %v429_v19 = vld [vmem:[%s160_s25 + $0x4] ss:$0 sm:$0xff]  ;;  %vm194_vm3 = vcmask 64512  }
  0x18   : >> { %v143_v11 = vsel %vm142_vm0, %v141_v8, 0.0  ;;  %v157_v12 = vsel %vm142_vm0, %v156_v10, 0.0  ;;  %v150_v13 = vsel %vm142_vm0, %v149_v9, 0.0  ;;  %vm207_vm4 = vcmask 7168   ;;  %s128_s11 = sadd.s32 1, %s544_s11  }
  0x19   : >> { %144 = vadd.xlane.f32.xlu0 %v143_v11  ;;  %158 = vadd.xlane.f32.xlu1 %v157_v12  ;;  %vm133_vm5 = vcmp.eq.s32.totalorder %v592_v1, %v132_v56  ;;  %p127_p5 = scmp.ge.s32.totalorder %s128_s11, 4 }
  0x1d   : >> { %151 = vadd.xlane.f32.xlu0 %v150_v13  ;;  %v198_v35 = vld [vmem:[#allocation2] sm:$0x1] }
  0xa6   : >> { %v145_v15 = vpop.xlane.xlu0 %144  ;;  %v159_v17 = vpop.xlane.xlu1 %158 }
  0xa7   : >> { %v174_v20 = vsub.f32 %v145_v15, %v428_v16  ;;  %v188_v21 = vsub.f32 %v159_v17, %v430_v18 }
  0xa9   : >> { %v189_v24 = vmul.f32 %v174_v20, %v174_v20  ;;  %v192_v26 = vmul.f32 %v188_v21, %v188_v21 }
  0xaa   : >> { %v152_v22 = vpop.xlane.xlu0 %151 }
  0xab   : >> { %v181_v23 = vsub.f32 %v152_v22, %v429_v19 }
  0xad   : >> { %v190_v25 = vmul.f32 %v181_v23, %v181_v23 }
  0xaf   : >> { %v191_v27 = vadd.f32 %v190_v25, %v189_v24 }
  0xb1   : >> { %v193_v28 = vadd.f32 %v192_v26, %v191_v27 }
  0xb3   : >> { %v195_v29 = vsel %vm194_vm3, %v193_v28, inf }
  0xb4   : >> { %196 = vmin.xlane.f32.xlu1 %v195_v29  ;;  %v199_v30 = vrot.slane %v195_v29, 4 }
  0xb6   : >> { %v200_v31 = vmin.f32 %v195_v29, %v199_v30 }
  0xb8   : >> { %v201_v32 = vrot.slane %v200_v31, 2 }
  0xba   : >> { %v202_v33 = vmin.f32 %v200_v31, %v201_v32 }
  0xbc   : >> { %v203_v34 = vrot.slane %v202_v33, 1 }
  0xbe   : >> { %v204_v36 = vmin.f32 %v202_v33, %v203_v34 }
  0xc0   : >> { %v205_v37 = vmin.f32 %v198_v35, %v204_v36 }
  0xc2   : >> { %206 = vst.msk [vmem:[#allocation2] sm:$0x1] %vm134_vm2, %v205_v37 }
  0xc9   : >> { %v219_v38 = vld [vmem:[#allocation2] sm:$0x1] }
  0xca   : >> { %v220_v39 = vsel %vm134_vm2, %v219_v38, 0.0 }
  0xcb   : >> { %221 = vadd.xlane.f32.xlu1 %v220_v39 }
 0x141   : >> { %v197_v40 = vpop.xlane.xlu1 %196 }
 0x142   : >> { %v208_v41 = vsel %vm207_vm4, %v197_v40, 0.0 }
 0x143   : >> { %209 = vadd.xlane.f32.xlu0 %v208_v41 }
 0x158   : >> { %v222_v42 = vpop.xlane.xlu1 %221 }
 0x159   : >> { %v223_v43 = vrot.slane %v222_v42, 4 }
 0x15b   : >> { %v224_v44 = vadd.f32 %v223_v43, %v222_v42 }
 0x15d   : >> { %v225_v45 = vrot.slane %v224_v44, 2 }
 0x15f   : >> { %v226_v49 = vadd.f32 %v225_v45, %v224_v44 }
 0x161   : >> { %v227_v52 = vrot.slane %v226_v49, 1 }
 0x163   : >> { %v228_v55 = vadd.f32 %v227_v52, %v226_v49 }
 0x1d0   : >> { %v210_v46 = vpop.xlane.xlu0 %209 }
 0x1d1   : >> { %v211_v47 = vrot.slane %v210_v46, 4 }
 0x1d3   : >> { %v212_v48 = vadd.f32 %v211_v47, %v210_v46 }
 0x1d5   : >> { %v213_v50 = vrot.slane %v212_v48, 2 }
 0x1d7   : >> { %v214_v51 = vadd.f32 %v213_v50, %v212_v48 }
 0x1d9   : >> { %v215_v53 = vrot.slane %v214_v51, 1 }
 0x1db   : >> { %v216_v54 = vadd.f32 %v215_v53, %v214_v51 }
 0x1dd   : >> { %440 = vpush %v216_v54 }
 0x1de   : >> { %442 = vpush %v228_v55 }
 0x20e   : >> { %s441_s26 = spop %440 }
 0x20f   : >> { %s443_s27 = spop %442 }
 0x210   : >> { %s230_s28 = sadd.f32 %s443_s27, %s441_s26  ;;  %130 = sbr.rel (!%p127_p5) target bundleno = 21 (0x15), region = 79 }
 0x212   : >> { %s231_s29 = smul.f32 0.125, %s230_s28 }
 0x214   : >> { %v232_v57 = vstv %s231_s29 }
 0x215   : >> { %v233_v58 = vsel %vm133_vm5, %v232_v57, %v540_v3  }
 0x216   : >> { %v694_v3 = vmov %v233_v58  ;;  %v695_v2 = vmov (%p127_p5), %v233_v58 }
 0x217 PF: > { %vm234_vm6 = vcmask 24576   ;;  %s236_s30 = ssub.s32 3, %s585_s10  ;;  %s237_s3 = ssub.s32 4, %s585_s10   ;;  %v644_v59 = vmov 0.0   ;;  %v548_v2 = vphi %v599_v2, %v695_v2  }
 0x218   : > { %235 = vst.msk [vmem:[%s597_s16] sm:$0x1] %vm234_vm6, %v548_v2  ;;  %p398_p6 = scmp.ge.s32.totalorder %s237_s3, 4 }
 0x219   : > { %v646_v60 = vmov (!%p398_p6), 0.0  }
 0x21a   : > { %400 = sbr.rel (%p398_p6) target bundleno = 1059 (0x423), region = 84 }
 0x221 LB: >> { %v249_v61 = vld [vmem:[%s692_s1] sm:$0xff]  ;;  %v250_v62 = vstv %s236_s30  ;;  %vm255_vm7 = vcmask 31744   ;;  %v431_v63 = vld [vmem:[%s692_s1 + $0x8] sm:$0xff]  ;;  %v432_v0 = vld [vmem:[%s692_s1 + $0x10] sm:$0xff]  ;;  %vm247_vm9 = vcmask 57344   ;;  %v563_v8 = vmov inf   ;;  %s273_s14 = scalar_lea.vmem %s691_s0, %s556_s3  ;;  %s556_s3 = sphi %s237_s3, %s241_s3   ;;  %v552_v60 = vphi %v646_v60, %v696_v60  }
 0x222   : >> { %vm251_vm8 = vcmp.eq.s32.totalorder %v592_v1, %v250_v62  ;;  %248 = vst.msk [vmem:[#allocation2] sm:$0x1] %vm247_vm9, %v563_v8  ;;  %v435_v10 = vld [vmem:[%s273_s14] ss:$0 sm:$0xff]  ;;  %v437_v12 = vld [vmem:[%s273_s14 + $0x8] ss:$0 sm:$0xff]  ;;  %v245_v50 = vstv %s556_s3 }
 0x223   : >> { %v254_v2 = vsel %vm251_vm8, %v249_v61, 0.0  ;;  %v262_v3 = vsel %vm251_vm8, %v431_v63, 0.0  ;;  %v269_v4 = vsel %vm251_vm8, %v432_v0, 0.0  ;;  %v436_v13 = vld [vmem:[%s273_s14 + $0x4] ss:$0 sm:$0xff]  ;;  %vm307_vm10 = vcmask 64512  }
 0x224   : >> { %v256_v5 = vsel %vm255_vm7, %v254_v2, 0.0  ;;  %v270_v6 = vsel %vm255_vm7, %v269_v4, 0.0  ;;  %v263_v7 = vsel %vm255_vm7, %v262_v3, 0.0  ;;  %vm320_vm11 = vcmask 7168   ;;  %s241_s3 = sadd.s32 1, %s556_s3  }
 0x225   : >> { %257 = vadd.xlane.f32.xlu0 %v256_v5  ;;  %271 = vadd.xlane.f32.xlu1 %v270_v6  ;;  %vm246_vm12 = vcmp.eq.s32.totalorder %v592_v1, %v245_v50  ;;  %p240_p7 = scmp.ge.s32.totalorder %s241_s3, 4 }
 0x229   : >> { %264 = vadd.xlane.f32.xlu0 %v263_v7  ;;  %v311_v29 = vld [vmem:[#allocation2] sm:$0x1] }
 0x2b2   : >> { %v258_v9 = vpop.xlane.xlu0 %257  ;;  %v272_v11 = vpop.xlane.xlu1 %271 }
 0x2b3   : >> { %v287_v14 = vsub.f32 %v258_v9, %v435_v10  ;;  %v301_v15 = vsub.f32 %v272_v11, %v437_v12 }
 0x2b5   : >> { %v302_v18 = vmul.f32 %v287_v14, %v287_v14  ;;  %v305_v20 = vmul.f32 %v301_v15, %v301_v15 }
 0x2b6   : >> { %v265_v16 = vpop.xlane.xlu0 %264 }
 0x2b7   : >> { %v294_v17 = vsub.f32 %v265_v16, %v436_v13 }
 0x2b9   : >> { %v303_v19 = vmul.f32 %v294_v17, %v294_v17 }
 0x2bb   : >> { %v304_v21 = vadd.f32 %v303_v19, %v302_v18 }
 0x2bd   : >> { %v306_v22 = vadd.f32 %v305_v20, %v304_v21 }
 0x2bf   : >> { %v308_v23 = vsel %vm307_vm10, %v306_v22, inf }
 0x2c0   : >> { %309 = vmin.xlane.f32.xlu1 %v308_v23  ;;  %v312_v24 = vrot.slane %v308_v23, 4 }
 0x2c2   : >> { %v313_v25 = vmin.f32 %v308_v23, %v312_v24 }
 0x2c4   : >> { %v314_v26 = vrot.slane %v313_v25, 2 }
 0x2c6   : >> { %v315_v27 = vmin.f32 %v313_v25, %v314_v26 }
 0x2c8   : >> { %v316_v28 = vrot.slane %v315_v27, 1 }
 0x2ca   : >> { %v317_v30 = vmin.f32 %v315_v27, %v316_v28 }
 0x2cc   : >> { %v318_v31 = vmin.f32 %v311_v29, %v317_v30 }
 0x2ce   : >> { %319 = vst.msk [vmem:[#allocation2] sm:$0x1] %vm247_vm9, %v318_v31 }
 0x2d5   : >> { %v332_v32 = vld [vmem:[#allocation2] sm:$0x1] }
 0x2d6   : >> { %v333_v33 = vsel %vm247_vm9, %v332_v32, 0.0 }
 0x2d7   : >> { %334 = vadd.xlane.f32.xlu1 %v333_v33 }
 0x34d   : >> { %v310_v34 = vpop.xlane.xlu1 %309 }
 0x34e   : >> { %v321_v35 = vsel %vm320_vm11, %v310_v34, 0.0 }
 0x34f   : >> { %322 = vadd.xlane.f32.xlu0 %v321_v35 }
 0x364   : >> { %v335_v36 = vpop.xlane.xlu1 %334 }
 0x365   : >> { %v336_v37 = vrot.slane %v335_v36, 4 }
 0x367   : >> { %v337_v38 = vadd.f32 %v336_v37, %v335_v36 }
 0x369   : >> { %v338_v39 = vrot.slane %v337_v38, 2 }
 0x36b   : >> { %v339_v43 = vadd.f32 %v338_v39, %v337_v38 }
 0x36d   : >> { %v340_v46 = vrot.slane %v339_v43, 1 }
 0x36f   : >> { %v341_v49 = vadd.f32 %v340_v46, %v339_v43 }
 0x3dc   : >> { %v323_v40 = vpop.xlane.xlu0 %322 }
 0x3dd   : >> { %v324_v41 = vrot.slane %v323_v40, 4 }
 0x3df   : >> { %v325_v42 = vadd.f32 %v324_v41, %v323_v40 }
 0x3e1   : >> { %v326_v44 = vrot.slane %v325_v42, 2 }
 0x3e3   : >> { %v327_v45 = vadd.f32 %v326_v44, %v325_v42 }
 0x3e5   : >> { %v328_v47 = vrot.slane %v327_v45, 1 }
 0x3e7   : >> { %v329_v48 = vadd.f32 %v328_v47, %v327_v45 }
 0x3e9   : >> { %444 = vpush %v329_v48 }
 0x3ea   : >> { %446 = vpush %v341_v49 }
 0x41a   : >> { %s445_s15 = spop %444 }
 0x41b   : >> { %s447_s17 = spop %446 }
 0x41c   : >> { %s343_s18 = sadd.f32 %s447_s17, %s445_s15  ;;  %243 = sbr.rel (!%p240_p7) target bundleno = 545 (0x221), region = 90 }
 0x41e   : >> { %s344_s19 = smul.f32 0.125, %s343_s18 }
 0x420   : >> { %v345_v51 = vstv %s344_s19 }
 0x421   : >> { %v346_v52 = vsel %vm246_vm12, %v345_v51, %v552_v60  }
 0x422   : >> { %v696_v60 = vmov %v346_v52  ;;  %v697_v59 = vmov (%p240_p7), %v346_v52 }
 0x423 PF: > { %347 = vst.msk [vmem:[%s597_s16 + $0x1] sm:$0x1] %vm234_vm6, %v560_v59  ;;  %v560_v59 = vphi %v644_v59, %v697_v59  }
 0x424 PF: > { %s12_s9 = sadd.s32 1, %s536_s9  }
 0x425   : > { %p9_p8 = scmp.ge.s32.totalorder %s12_s9, 4  }
 0x427   :  { %11 = sbr.rel (!%p9_p8) target bundleno = 1 (0x1), region = 101 }

</bundles_post_ra>
